<compile_context>
chip_gen: v6e
topology: v6e:2x2x1
jax: 0.10.0
libtpu: 0.0.40
codegen_flags: <defaults>
</compile_context>

<pallas_src>
import jax
import jax.numpy as jnp
from jax.experimental import pallas as pl
from jax.experimental.pallas import tpu as pltpu


IN_F = 28 * 28   # 784
OUT_F = 10       # true output features
N_PAD = 128      # lane-dense padded weight width (MXU-friendly)


def _round_up(n: int, m: int) -> int:
    return ((n + m - 1) // m) * m


def linear_kernel(x_ref, w_ref, b_ref, o_ref):
    # x_ref: (tb, 784) f32   w_ref: (784, 128) bf16
    # b_ref: (1, 10)   f32   o_ref: (tb, 10)   f32
    x = x_ref[...].astype(jnp.bfloat16)            # in-kernel cast (VPU, hidden under DMA)
    acc = jnp.dot(x, w_ref[...],
                  preferred_element_type=jnp.float32)   # (tb, 128) f32 MXU accumulate
    o_ref[...] = (acc[:, :OUT_F] + b_ref[...]).astype(o_ref.dtype)


def prepare_params(w_pt, b):
    """One-time preprocessing (hoisted out of the forward path).

    w_pt: (10, 784) PyTorch layout, b: (10,)
    Returns w_t_pad: (784, 128) bf16 (zero-padded cols 10..127),
            b2d:     (1, 10)    f32.
    """
    w_t_pad = jnp.zeros((IN_F, N_PAD), jnp.bfloat16)
    w_t_pad = w_t_pad.at[:, :OUT_F].set(w_pt.T.astype(jnp.bfloat16))
    b2d = b.astype(jnp.float32).reshape(1, OUT_F)
    return w_t_pad, b2d


def dummy_model_forward(x, w_t_pad, b2d, *, tile_b=1024):
    """x: (B, 784) f32, w_t_pad: (784, 128) bf16, b2d: (1, 10) f32 -> (B, 10) f32"""
    B = x.shape[0]

    # Pick the tile count first, then the tile size (bounds waste to <8 rows/tile).
    n = max(1, pl.cdiv(B, tile_b))
    if B >= 16:
        n = max(n, 2)   # >=2 grid steps: v7x megacore sharding + DMA/compute overlap
    tb = _round_up(pl.cdiv(B, n), 8)
    grid = pl.cdiv(B, tb)   # ragged last block handled by Pallas (OOB writes dropped)

    # VMEM footprint: 2x double-buffered f32 x tile + 2x (lane-padded) out tile
    # + resident bf16 W + bias, plus headroom for compiler scratch.
    footprint = (2 * tb * IN_F * 4        # x tiles (f32, double-buffered)
                 + 2 * tb * N_PAD * 4     # out tiles (lane-padded in VMEM)
                 + IN_F * N_PAD * 2       # resident W (bf16)
                 + N_PAD * 4)             # bias
    vmem_limit = max(int(footprint * 1.5) + (2 << 20), 8 << 20)

    cost = pl.CostEstimate(
        flops=2 * B * IN_F * N_PAD,
        transcendentals=0,
        bytes_accessed=B * IN_F * 4 + B * OUT_F * 4 + IN_F * N_PAD * 2,
    )

    return pl.pallas_call(
        linear_kernel,
        out_shape=jax.ShapeDtypeStruct((B, OUT_F), jnp.float32),
        grid_spec=pltpu.PrefetchScalarGridSpec(
            num_scalar_prefetch=0,
            grid=(grid,),
            in_specs=[
                # x tiles stream over the batch grid (double-buffered by Pallas).
                pl.BlockSpec((tb, IN_F), lambda i: (i, 0)),
                # W and bias stay VMEM-resident across the whole grid.
                pl.BlockSpec((IN_F, N_PAD), lambda i: (0, 0)),
                pl.BlockSpec((1, OUT_F), lambda i: (0, 0)),
            ],
            out_specs=pl.BlockSpec((tb, OUT_F), lambda i: (i, 0)),
        ),
        compiler_params=pltpu.CompilerParams(
            dimension_semantics=("parallel",),   # megacore sharding on v7x
            vmem_limit_bytes=vmem_limit,
        ),
        cost_estimate=cost,
    )(x, w_t_pad, b2d)


def init_params(key):
    # PyTorch nn.Linear default init: U(-1/sqrt(fan_in), 1/sqrt(fan_in))
    k_w, k_b = jax.random.split(key)
    bound = 1.0 / jnp.sqrt(float(IN_F))
    w_pt = jax.random.uniform(k_w, (OUT_F, IN_F), jnp.float32, -bound, bound)
    b = jax.random.uniform(k_b, (OUT_F,), jnp.float32, -bound, bound)
    return w_pt, b


def _reference_bf16(x, w_pt, b):
    # Precision-matched reference: bf16 x and W, f32 accumulation, f32 bias add.
    xb = x.astype(jnp.bfloat16).astype(jnp.float32)
    wb = w_pt.T.astype(jnp.bfloat16).astype(jnp.float32)
    return xb @ wb + b


if __name__ == "__main__":
    key = jax.random.PRNGKey(0)
    k_x, k_p, k_x2, k_x3 = jax.random.split(key, 4)

    w_pt, b = init_params(k_p)                 # PyTorch-layout params (10, 784), (10,)
    w_t_pad, b2d = prepare_params(w_pt, b)     # one-time padded/transposed/bf16 params

    # Case 1: small batch, single grid step.
    B = 8
    x = jax.random.normal(k_x, (B, IN_F), dtype=jnp.float32)
    out = jax.block_until_ready(dummy_model_forward(x, w_t_pad, b2d))
    assert out.shape == (B, OUT_F)
    ref_match = _reference_bf16(x, w_pt, b)
    ref_f32 = x @ w_pt.T + b
    assert jnp.allclose(out, ref_match, atol=2e-3, rtol=2e-3)
    assert jnp.allclose(out, ref_f32, atol=5e-2, rtol=5e-2)

    # Case 2: multi-step pipelined grid with a ragged last block (40 = 16+16+8).
    B2 = 40
    x2 = jax.random.normal(k_x2, (B2, IN_F), dtype=jnp.float32)
    out2 = jax.block_until_ready(dummy_model_forward(x2, w_t_pad, b2d, tile_b=16))
    assert out2.shape == (B2, OUT_F)
    ref2 = _reference_bf16(x2, w_pt, b)
    assert jnp.allclose(out2, ref2, atol=2e-3, rtol=2e-3)

    # Case 3: batch not a multiple of 8 (masked sublane rows in the last block).
    B3 = 13
    x3 = jax.random.normal(k_x3, (B3, IN_F), dtype=jnp.float32)
    out3 = jax.block_until_ready(dummy_model_forward(x3, w_t_pad, b2d))
    assert out3.shape == (B3, OUT_F)
    ref3 = _reference_bf16(x3, w_pt, b)
    assert jnp.allclose(out3, ref3, atol=2e-3, rtol=2e-3)

    print("KERNEL_OK")
</pallas_src>

<mosaic_0001>
module attributes {stable_mosaic.version = 11 : i64} {
  func.func @linear_kernel(%arg0: i32, %arg1: memref<8x784xf32, #tpu.memory_space<vmem>>, %arg2: memref<784x128xbf16, #tpu.memory_space<vmem>>, %arg3: memref<1x10xf32, #tpu.memory_space<vmem>>, %arg4: memref<8x10xf32, #tpu.memory_space<vmem>>) attributes {dimension_semantics = [#tpu.dimension_semantics<parallel>], iteration_bounds = array<i64: 1>, scalar_prefetch = 0 : i64, scratch_operands = 0 : i64, tpu.core_type = #tpu.core_type<tc>, window_params = [{transform_indices = @transform_0, window_bounds = array<i64: 8, 784>}, {pipeline_mode = #tpu.pipeline_mode<synchronous>, transform_indices = @transform_1, window_bounds = array<i64: 784, 128>}, {pipeline_mode = #tpu.pipeline_mode<synchronous>, transform_indices = @transform_2, window_bounds = array<i64: 1, 10>}, {transform_indices = @transform_3, window_bounds = array<i64: 8, 10>}]} {
    %c0 = arith.constant 0 : index
    %c0_0 = arith.constant 0 : index
    %0 = vector.load %arg1[%c0, %c0_0] : memref<8x784xf32, #tpu.memory_space<vmem>>, vector<8x784xf32>
    %1 = arith.truncf %0 : vector<8x784xf32> to vector<8x784xbf16>
    %c0_1 = arith.constant 0 : index
    %c0_2 = arith.constant 0 : index
    %2 = vector.load %arg2[%c0_1, %c0_2] : memref<784x128xbf16, #tpu.memory_space<vmem>>, vector<784x128xbf16>
    %cst = arith.constant dense<0.000000e+00> : vector<8x128xf32>
    %3 = tpu.matmul %1, %2, %cst {dimension_numbers = #tpu.dot_dimension_numbers<[1], [0], [0], [1], [0, 0, 1, 1], [], []>} : vector<8x784xbf16>, vector<784x128xbf16>, vector<8x128xf32> -> vector<8x128xf32>
    %4 = vector.extract_strided_slice %3 {offsets = [0, 0], sizes = [8, 10], strides = [1, 1]} : vector<8x128xf32> to vector<8x10xf32>
    %c0_3 = arith.constant 0 : index
    %c0_4 = arith.constant 0 : index
    %5 = vector.load %arg3[%c0_3, %c0_4] : memref<1x10xf32, #tpu.memory_space<vmem>>, vector<1x10xf32>
    %6 = vector.broadcast %5 : vector<1x10xf32> to vector<8x10xf32>
    %7 = arith.addf %4, %6 : vector<8x10xf32>
    %c0_5 = arith.constant 0 : index
    %c0_6 = arith.constant 0 : index
    %8 = vector.load %arg4[%c0_5, %c0_6] : memref<8x10xf32, #tpu.memory_space<vmem>>, vector<8x10xf32>
    tpu.vector_store %arg4[%c0_5, %c0_6], %7 {strides = array<i32>} : memref<8x10xf32, #tpu.memory_space<vmem>>, vector<8x10xf32>,
    return
  }
  func.func @transform_0(%arg0: i32) -> (i32, i32) {
    %c0_i32 = arith.constant 0 : i32
    %c0_i32_0 = arith.constant 0 : i32
    return %arg0, %c0_i32 : i32, i32
  }
  func.func @transform_1(%arg0: i32) -> (i32, i32) {
    %c0_i32 = arith.constant 0 : i32
    %c0_i32_0 = arith.constant 0 : i32
    %c0_i32_1 = arith.constant 0 : i32
    return %c0_i32, %c0_i32_0 : i32, i32
  }
  func.func @transform_2(%arg0: i32) -> (i32, i32) {
    %c0_i32 = arith.constant 0 : i32
    %c0_i32_0 = arith.constant 0 : i32
    %c0_i32_1 = arith.constant 0 : i32
    return %c0_i32, %c0_i32_0 : i32, i32
  }
  func.func @transform_3(%arg0: i32) -> (i32, i32) {
    %c0_i32 = arith.constant 0 : i32
    %c0_i32_0 = arith.constant 0 : i32
    return %arg0, %c0_i32 : i32, i32
  }
}

</mosaic_0001>

<bundles_post_ra>
// kernel: tpu_custom_call.1
= control target key start
LH: loop header
LB: loop body
LE: loop exit
PB: predicated region body
PF: predicated region fallthrough
CT: control target
= control target key end

     0   :  { %8 = vsyncpa [#allocation3], 0  ;;  %s924_s0 = inlined_call_operand.hbm [shape: f32[8,784], index: 0, kind: input, shape index: {}]   ;;  %s925_s1 = inlined_call_operand.hbm [shape: bf16[784,128], index: 1, kind: input, shape index: {}]   ;;  %s926_s2 = inlined_call_operand.vmem [shape: f32[1,10], index: 2, kind: input, shape index: {}]   ;;  %s927_s3 = inlined_call_operand.hbm [shape: f32[8,10], index: 3, kind: output, shape index: {}]  }
   0x1   :  { %9 = vsyncpa [#allocation6], 0 }
   0x2   :  { %10 = vsyncpa [#allocation4], 0  ;;  %s885_s12 = smov [#allocation2]   ;;  %s886_s14 = smov [#allocation5]  }
   0x3   :  { %s17_s13 = sshll.u32 %s885_s12, 4  ;;  %s26_s15 = sshll.u32 %s886_s14, 4  ;;  %s18_s13 = int_to_ptr.vmem [resolvable:$true] %s17_s13  ;;  %s27_s15 = int_to_ptr.vmem [resolvable:$true] %s26_s15 }
   0x4   :  { %s827_s16 = scalar_lea.vmem %s18_s13, 896  ;;  %p832_p1 = scmp.lt.s32.totalorder %s18_s13, %s18_s13 }
   0x5   :  { %p828_p0 = scmp.ne.s32.totalorder %s18_s13, %s827_s16  ;;  %p833_p2 = scmp.lt.s32.totalorder %s827_s16, %s827_s16 }
   0x7   :  { %p834_p3 = por %p833_p2, %p832_p1 }
   0x9   :  { %p835_p4 = pnand %p834_p3, %p828_p0 }
   0xb   :  { %838 = shalt.err (!%p835_p4)
}
   0xc   :  { %20 = dma.hbm_to_vmem [thread:$0]  %s924_s0, 896, %s18_s13, [#allocation3]  }
   0xd   :  { %s847_s19 = scalar_lea.vmem %s27_s15, 6272  ;;  %p852_p6 = scmp.lt.s32.totalorder %s27_s15, %s27_s15 }
   0xe   :  { %p848_p5 = scmp.ne.s32.totalorder %s27_s15, %s847_s19  ;;  %p853_p7 = scmp.lt.s32.totalorder %s847_s19, %s847_s19 }
  0x10   :  { %p854_p8 = por %p853_p7, %p852_p6 }
  0x12   :  { %p855_p9 = pnand %p854_p8, %p848_p5 }
  0x14   :  { %858 = shalt.err (!%p855_p9)
}
  0x15   :  { %s887_s20 = smov 64   ;;  %s888_s21 = smov 4  }
  0x16   :  { %32 = dma.hbm_to_vmem [thread:$0]  %s925_s1, 6272, %s27_s15, [#allocation6], %s887_s20, %s887_s20, %s888_s21  }
  0x17   :  { %879 = dma.done.wait [#allocation3], 896  }
  0x18   :  { %880 = vsyncadd [#allocation3], 4294966400 }
  0x19   :  { %881 = dma.done.wait [#allocation6], 6272  }
  0x1a   :  { %882 = vsyncadd [#allocation6], 4294961024  ;;  %v770_v0 = vld [vmem:[#allocation5 + $0x78] sm:$0xff]   ;;  %v774_v4 = vld [vmem:[#allocation5 + $0x70] sm:$0xff]   ;;  %v889_v41 = vmov 0.0   ;;  %vm890_vm0 = vmmov 0  }
  0x1b   :  { %v771_v1 = vld [vmem:[#allocation5 + $0xf8] sm:$0xff]   ;;  %689 = vmatprep.subr.bf16.mxu0 %v770_v0  ;;  %v775_v5 = vld [vmem:[#allocation5 + $0xf0] sm:$0xff]   ;;  %v778_v8 = vld [vmem:[#allocation5 + $0x68] sm:$0xff]   ;;  %vm448_vm1 = vcmask 130048   ;;  %s891_s24 = smov [#allocation7]   ;;  %vm620_vm2 = vcmask 80896  }
  0x1c   :  { %v772_v2 = vld [vmem:[#allocation5 + $0x38] sm:$0xff]   ;;  %711 = vmatprep.subr.bf16.mxu1 %v771_v1  ;;  %v776_v6 = vld [vmem:[#allocation5 + $0x30] sm:$0xff]   ;;  %v779_v9 = vld [vmem:[#allocation5 + $0xe8] sm:$0xff]   ;;  %s628_s25 = sshll.u32 %s891_s24, 4  ;;  %s629_s25 = int_to_ptr.vmem [resolvable:$true] %s628_s25 }
  0x1d   :  { %v773_v3 = vld [vmem:[#allocation5 + $0xb8] sm:$0xff]   ;;  %690 = vmatpush3.bf16.msra.mxu0 %v772_v2  ;;  %v777_v7 = vld [vmem:[#allocation5 + $0xb0] sm:$0xff]   ;;  %v780_v10 = vld [vmem:[#allocation5 + $0x28] sm:$0xff]   ;;  %s859_s26 = scalar_lea.vmem %s629_s25, 128  ;;  %p864_p11 = scmp.lt.s32.totalorder %s629_s25, %s629_s25 }
  0x1e   :  { %712 = vmatpush3.bf16.msra.mxu1 %v773_v3  ;;  %691 = vmatprep.subr.bf16.mxu0 %v774_v4  ;;  %v781_v11 = vld [vmem:[#allocation5 + $0xa8] sm:$0xff]   ;;  %v782_v12 = vld [vmem:[#allocation5 + $0x60] sm:$0xff]   ;;  %v786_v16 = vld [vmem:[#allocation5 + $0x58] sm:$0xff]   ;;  %p860_p10 = scmp.ne.s32.totalorder %s629_s25, %s859_s26  ;;  %p865_p12 = scmp.lt.s32.totalorder %s859_s26, %s859_s26 }
  0x1f   :  { %713 = vmatprep.subr.bf16.mxu1 %v775_v5  ;;  %v783_v13 = vld [vmem:[#allocation5 + $0xe0] sm:$0xff]   ;;  %v787_v17 = vld [vmem:[#allocation5 + $0xd8] sm:$0xff]   ;;  %v790_v20 = vld [vmem:[#allocation5 + $0x50] sm:$0xff]  }
  0x20   :  { %v784_v14 = vld [vmem:[#allocation5 + $0x20] sm:$0xff]   ;;  %v788_v18 = vld [vmem:[#allocation5 + $0x18] sm:$0xff]   ;;  %v791_v21 = vld [vmem:[#allocation5 + $0xd0] sm:$0xff]   ;;  %p866_p13 = por %p865_p12, %p864_p11 }
  0x21   :  { %692 = vmatpush3.bf16.msra.mxu0 %v776_v6  ;;  %v785_v15 = vld [vmem:[#allocation5 + $0xa0] sm:$0xff]   ;;  %v789_v19 = vld [vmem:[#allocation5 + $0x98] sm:$0xff]   ;;  %v792_v22 = vld [vmem:[#allocation5 + $0x10] sm:$0xff]  }
  0x22   :  { %714 = vmatpush3.bf16.msra.mxu1 %v777_v7  ;;  %693 = vmatprep.subr.bf16.mxu0 %v778_v8  ;;  %v793_v23 = vld [vmem:[#allocation5 + $0x90] sm:$0xff]   ;;  %v794_v24 = vld [vmem:[#allocation5 + $0x48] sm:$0xff]   ;;  %v798_v28 = vld [vmem:[#allocation5 + $0x40] sm:$0xff]   ;;  %p867_p0 = pnand %p866_p13, %p860_p10 }
  0x23   :  { %715 = vmatprep.subr.bf16.mxu1 %v779_v9  ;;  %v795_v25 = vld [vmem:[#allocation5 + $0xc8] sm:$0xff]   ;;  %v799_v29 = vld [vmem:[#allocation5 + $0xc0] sm:$0xff]   ;;  %v43_v32 = vld [vmem:[#allocation2 + $0x8] sm:$0xff] }
  0x24   :  { %v796_v26 = vld [vmem:[#allocation5 + $0x8] sm:$0xff]   ;;  %v800_v30 = vld [vmem:[#allocation5] sm:$0xff]   ;;  %v50_v35 = vpack.c.bf16 %v43_v32, %v43_v32  ;;  %v44_v38 = vld [vmem:[#allocation2 + $0x10] sm:$0xff] }
  0x25   :  { %694 = vmatpush3.bf16.msra.mxu0 %v780_v10  ;;  %v797_v27 = vld [vmem:[#allocation5 + $0x88] sm:$0xff]   ;;  %v801_v31 = vld [vmem:[#allocation5 + $0x80] sm:$0xff]   ;;  %v51_v39 = vpack.c.bf16 %v44_v38, %v44_v38  ;;  %v802_v40 = vld [vmem:[#allocation5 + $0x178] sm:$0xff]  }
  0x26   :  { %716 = vmatpush3.bf16.msra.mxu1 %v781_v11  ;;  %695 = vmatprep.subr.bf16.mxu0 %v782_v12  ;;  %v45_v33 = vld [vmem:[#allocation2 + $0x18] sm:$0xff]  ;;  %v42_v34 = vld [vmem:[#allocation2] sm:$0xff]  ;;  %v803_v42 = vld [vmem:[#allocation5 + $0x138] sm:$0xff]  }
  0x27   :  { %717 = vmatprep.subr.bf16.mxu1 %v783_v13  ;;  %v52_v36 = vpack.c.bf16 %v45_v33, %v45_v33  ;;  %v49_v37 = vpack.c.bf16 %v42_v34, %v42_v34  ;;  %484 = vmatprep.mubr.bf16.mxu0 %v50_v35  ;;  %v804_v43 = vld [vmem:[#allocation5 + $0x170] sm:$0xff]   ;;  %v806_v45 = vld [vmem:[#allocation5 + $0x168] sm:$0xff]   ;;  %v808_v47 = vld [vmem:[#allocation5 + $0x160] sm:$0xff]  }
  0x28   :  { %v805_v44 = vld [vmem:[#allocation5 + $0x130] sm:$0xff]   ;;  %v807_v46 = vld [vmem:[#allocation5 + $0x128] sm:$0xff]   ;;  %v809_v48 = vld [vmem:[#allocation5 + $0x120] sm:$0xff]  }
  0x29   :  { %696 = vmatpush3.bf16.msra.mxu0 %v784_v14  ;;  %524 = vmatprep.mubr.bf16.mxu1 %v52_v36  ;;  %v810_v49 = vld [vmem:[#allocation5 + $0x158] sm:$0xff]   ;;  %v818_v51 = vld [vmem:[#allocation5 + $0x180] sm:$0xff]   ;;  %v47_v52 = vld [vmem:[#allocation2 + $0x28] sm:$0xff] }
  0x2a   :  { %718 = vmatpush3.bf16.msra.mxu1 %v785_v15  ;;  %697 = vmatprep.subr.bf16.mxu0 %v786_v16  ;;  %v811_v50 = vld [vmem:[#allocation5 + $0x118] sm:$0xff]   ;;  %v812_v53 = vld [vmem:[#allocation5 + $0x150] sm:$0xff]   ;;  %v54_v54 = vpack.c.bf16 %v47_v52, %v47_v52  ;;  %v814_v58 = vld [vmem:[#allocation5 + $0x148] sm:$0xff]  }
  0x2b   :  { %719 = vmatprep.subr.bf16.mxu1 %v787_v17  ;;  %v48_v55 = vld [vmem:[#allocation2 + $0x30] sm:$0xff]  ;;  %v813_v57 = vld [vmem:[#allocation5 + $0x110] sm:$0xff]   ;;  %v815_v59 = vld [vmem:[#allocation5 + $0x108] sm:$0xff]  }
  0x2c   :  { %v55_v56 = vpack.c.bf16 %v48_v55, %v48_v55  ;;  %v816_v60 = vld [vmem:[#allocation5 + $0x140] sm:$0xff]   ;;  %v46_v62 = vld [vmem:[#allocation2 + $0x20] sm:$0xff] }
  0x2d   :  { %698 = vmatpush3.bf16.msra.mxu0 %v788_v18  ;;  %v817_v61 = vld [vmem:[#allocation5 + $0x100] sm:$0xff]   ;;  %v53_v63 = vpack.c.bf16 %v46_v62, %v46_v62 }
  0x2e   :  { %720 = vmatpush3.bf16.msra.mxu1 %v789_v19  ;;  %699 = vmatprep.subr.bf16.mxu0 %v790_v20 }
  0x2f   :  { %721 = vmatprep.subr.bf16.mxu1 %v791_v21  ;;  %v688_v21 = vld [vmem:[%s926_s2] ss:$0 sm:$0xff] }
  0x31   :  { %700 = vmatpush3.bf16.msra.mxu0 %v792_v22 }
  0x32   :  { %722 = vmatpush3.bf16.msra.mxu1 %v793_v23  ;;  %701 = vmatprep.subr.bf16.mxu0 %v794_v24 }
  0x33   :  { %723 = vmatprep.subr.bf16.mxu1 %v795_v25 }
  0x35   :  { %702 = vmatpush3.bf16.msra.mxu0 %v796_v26 }
  0x36   :  { %724 = vmatpush3.bf16.msra.mxu1 %v797_v27  ;;  %703 = vmatprep.subr.bf16.mxu0 %v798_v28 }
  0x37   :  { %725 = vmatprep.subr.bf16.mxu1 %v799_v29 }
  0x39   :  { %704 = vmatpush3.bf16.msra.mxu0 %v800_v30 }
  0x3a   :  { %726 = vmatpush3.bf16.msra.mxu1 %v801_v31  ;;  %733 = vmatprep.subr.bf16.mxu0 %v802_v40 }
  0x3b   :  { %757 = vmatprep.subr.bf16.mxu1 %v889_v41 }
  0x3c   :  { %485 = vmatmul.mubr.bf16.vlgmr.msra.gmra.mxu0 %v49_v37 }
  0x3d   :  { %525 = vmatmul.mubr.bf16.vlgmr.msra.gmra.mxu1 %v51_v39  ;;  %734 = vmatpush3.bf16.msra.mxu0 %v803_v42 }
  0x3e   :  { %759 = vmatprep.mubr.msk.bf16.mxu1 %vm890_vm0, %v889_v41  ;;  %735 = vmatprep.subr.bf16.mxu0 %v804_v43 }
  0x3f   :  { %758 = vmatpush3.bf16.msra.mxu1 %v818_v51  ;;  %564 = vmatprep.mubr.bf16.mxu0 %v54_v54 }
  0x41   :  { %736 = vmatpush3.bf16.msra.mxu0 %v805_v44 }
  0x42   :  { %737 = vmatprep.subr.bf16.mxu0 %v806_v45 }
  0x45   :  { %738 = vmatpush3.bf16.msra.mxu0 %v807_v46  ;;  %760 = vmatmul.mubr.msk.bf16.vlgmr.msra.gmra.mxu1 %vm448_vm1, %v55_v56 }
  0x46   :  { %739 = vmatprep.subr.bf16.mxu0 %v808_v47 }
  0x49   :  { %740 = vmatpush3.bf16.msra.mxu0 %v809_v48 }
  0x4a   :  { %741 = vmatprep.subr.bf16.mxu0 %v810_v49 }
  0x4d   :  { %742 = vmatpush3.bf16.msra.mxu0 %v811_v50 }
  0x4e   :  { %743 = vmatprep.subr.bf16.mxu0 %v812_v53 }
  0x51   :  { %744 = vmatpush3.bf16.msra.mxu0 %v813_v57 }
  0x52   :  { %745 = vmatprep.subr.bf16.mxu0 %v814_v58 }
  0x55   :  { %746 = vmatpush3.bf16.msra.mxu0 %v815_v59 }
  0x56   :  { %747 = vmatprep.subr.bf16.mxu0 %v816_v60 }
  0x59   :  { %748 = vmatpush3.bf16.msra.mxu0 %v817_v61 }
  0x5c   :  { %565 = vmatmul.mubr.bf16.vlgmr.msra.gmra.mxu0 %v53_v63 }
  0xfc   :  { %v705_v0 = vpop.f32.mrf.mxu0 }
  0xfd   :  { %v727_v1 = vpop.f32.mrf.mxu1 }
  0xfe   :  { %v706_v2 = vpop.f32.mrf.mxu0 }
  0xff   :  { %v728_v3 = vpop.f32.mrf.mxu1  ;;  %v707_v12 = vadd.f32 %v706_v2, %v705_v0 }
 0x100   :  { %v708_v4 = vpop.f32.mrf.mxu0  ;;  %v729_v13 = vadd.f32 %v728_v3, %v727_v1 }
 0x101   :  { %v730_v5 = vpop.f32.mrf.mxu1 }
 0x102   :  { %v709_v6 = vpop.f32.mrf.mxu0  ;;  %v527_v16 = vadd.f32 %v729_v13, %v707_v12 }
 0x103   :  { %v731_v7 = vpop.f32.mrf.mxu1 }
 0x105   :  { %v606_v8 = vpop.f32.mrf.mxu1 }
 0x107   :  { %v761_v9 = vpop.f32.mrf.mxu1 }
 0x109   :  { %v609_v10 = vpop.f32.mrf.mxu1 }
 0x10b   :  { %v762_v11 = vpop.f32.mrf.mxu1 }
 0x11c   :  { %v749_v14 = vpop.f32.mrf.mxu0 }
 0x11e   :  { %v750_v15 = vpop.f32.mrf.mxu0 }
 0x11f   :  { %v751_v17 = vadd.f32 %v750_v15, %v749_v14 }
 0x120   :  { %v752_v18 = vpop.f32.mrf.mxu0 }
 0x121   :  { %v567_v19 = vadd.f32 %v751_v17, %v527_v16 }
 0x122   :  { %v753_v20 = vpop.f32.mrf.mxu0 }
 0x123   :  { %v607_v22 = vadd.f32 %v606_v8, %v567_v19 }
 0x125   :  { %v619_v23 = vadd.f32 %v688_v21, %v607_v22 }
 0x127   :  { %621 = vst.msk [vmem:[#allocation7] sm:$0xff] %vm620_vm2, %v619_v23 }
 0x128   :  { %870 = shalt.err (!%p867_p0)
}
 0x129   :  { %631 = dma.vmem_to_hbm [thread:$0]  %s629_s25, 128, %s927_s3, [#allocation4]  }
 0x12a   :  { %883 = dma.done.wait [#allocation4], 128  }
 0x12b   :  { %884 = vsyncadd [#allocation4], 4294967168 }
 0x12c   :  { %635 = vsyncpa [#allocation3], 1 }
 0x12d   :  { %636 = vsyncpa [#allocation6], 1 }
 0x12e   :  { %637 = vsyncpa [#allocation4], 1 }

</bundles_post_ra>
